<compile_context>
chip_gen: v7x
topology: tpu7x:2x2x1
jax: 0.10.0
libtpu: 0.0.40
codegen_flags: <defaults>
</compile_context>

<pallas_src>
import jax
import jax.numpy as jnp
from jax.experimental import pallas as pl
from jax.experimental.pallas import tpu as pltpu


def _attention_kernel(x_ref, w1_ref, b1_ref, w2_ref, b2_ref, w3_ref, o_ref):
    tb, s, d = x_ref.shape
    h2_dim = w2_ref.shape[1]

    # Flatten (TB, S, D) -> (TB*S, D).  S is a multiple of 8 so this merge is
    # sublane-exact (layout-free) and gives the MXU a tall M dimension.
    x = x_ref[...].reshape(tb * s, d).astype(jnp.bfloat16)

    # Linear(D, D/2) + ReLU   (bf16 MXU operands, f32 accumulate / epilogue).
    h1 = jnp.dot(x, w1_ref[...], preferred_element_type=jnp.float32)
    h1 = jnp.maximum(h1 + b1_ref[...], 0.0)

    # Dropout(0.3): identity at inference.
    # TODO(synk): training-mode dropout (Bernoulli mask, p=0.3) not implemented.

    # Linear(D/2, D/4) + ReLU.
    h2 = jnp.dot(h1.astype(jnp.bfloat16), w2_ref[...],
                 preferred_element_type=jnp.float32)
    h2 = jnp.maximum(h2 + b2_ref[...], 0.0)

    # Linear(D/4, 1) as a VPU multiply + XLU lane reduction (an (M,K)x(K,1)
    # MXU matmul would waste 127/128 output lanes).  The scalar b3 added to
    # every logit of a row cancels in the softmax, so it is dropped.
    h2 = h2.reshape(tb, s, h2_dim)                     # sublane-exact split
    w3 = w3_ref[...].reshape(1, 1, h2_dim)
    logits = jnp.sum(h2 * w3, axis=-1)                 # (TB, S), S on lanes

    # Softmax over the sequence axis (PyTorch dim=1), now the lane axis.
    # Exact divide: the approx EUP reciprocal saved nothing measurable here but
    # cost ~1e-3 of row-sum drift.
    m = jnp.max(logits, axis=-1, keepdims=True)
    e = jnp.exp(logits - m)
    denom = jnp.sum(e, axis=-1, keepdims=True)
    o_ref[...] = (e / denom).astype(o_ref.dtype)


def _choose_block_b(B, S, D, x_itemsize, weight_bytes):
    """Batch-tile size from a VMEM byte budget (not a fixed row count)."""
    budget = 40 * 1024 * 1024          # conservative across v5e / v6e / v7x
    target_x_block = 6 * 1024 * 1024   # ~6 MiB x block per grid step
    per_row = S * (D * x_itemsize + 4)           # x row + f32 output row
    avail = max(budget - weight_bytes, 1 << 20)  # weights are single-buffered
    rows_cap = max(1, (avail // 2) // per_row)   # x/out blocks double-buffered
    rows = min(max(1, target_x_block // max(1, S * D * x_itemsize)), rows_cap)

    if rows >= B:
        # Whole batch fits comfortably in one block.  Keep >= 2 grid steps when
        # B allows it so the "parallel" batch axis can be sharded across v7x's
        # two TensorCores (v5e/v6e have 1 TC: a single block stays optimal).
        if B >= 16:
            return max(8, ((B // 2) // 8) * 8)
        return B

    tb = max(8, (rows // 8) * 8)   # multiple of 8: lane-dense (TB,S) out block
    if tb >= B:                    # re-clamp after rounding (e.g. small B)
        return B
    return tb


def attention_net_forward(x, params, *, block_b=None):
    """x: (B, S, D) float32 or bfloat16.  Returns attention weights (B, S, 1) f32."""
    w1, b1, w2, b2, w3, b3 = params
    del b3  # scalar bias on the last Linear is a softmax no-op
    B, S, D = x.shape
    H1 = w1.shape[1]
    H2 = w2.shape[1]
    assert S % 8 == 0, "sequence length must be a multiple of 8 (sublane fold)"

    # bf16 weights at the call boundary: halves weight HBM/VMEM traffic and
    # feeds the MXU its native input dtype.  Biases and the epilogue stay f32.
    # x is taken in whatever dtype the producer emits (pass bf16 x to halve the
    # dominant HBM read); the kernel casts to bf16 before the first matmul.
    w1_bf = w1.astype(jnp.bfloat16)
    w2_bf = w2.astype(jnp.bfloat16)
    w3_row = w3.reshape(1, H2).astype(jnp.float32)      # (H2, 1) -> (1, H2)

    x_itemsize = jnp.dtype(x.dtype).itemsize
    weight_bytes = (D * H1 + H1 * H2) * 2 + (H1 + H2 + H2) * 4

    tb = block_b if block_b is not None else _choose_block_b(
        B, S, D, x_itemsize, weight_bytes)
    nb = pl.cdiv(B, tb)   # last block may be ragged; no jnp.pad pass over x

    # TODO(synk): on v5e, H1/H2 not multiples of 128 give masked MXU result
    # pops / partial stores; hidden-width padding is not done here.

    def invariant(shape):
        # Grid-invariant operand: never re-DMA'd, so single-buffer it to free
        # VMEM for a larger x tile.
        return pl.BlockSpec(shape, lambda b: (0,) * len(shape),
                            pipeline_mode=pl.Buffered(buffer_count=1))

    grid_spec = pltpu.PrefetchScalarGridSpec(
        num_scalar_prefetch=0,
        grid=(nb,),
        in_specs=[
            pl.BlockSpec((tb, S, D), lambda b: (b, 0, 0)),   # x: TB batch rows
            invariant((D, H1)),                              # W1 (bf16)
            invariant((1, H1)),                              # b1
            invariant((H1, H2)),                             # W2 (bf16)
            invariant((1, H2)),                              # b2
            invariant((1, H2)),                              # w3 row vector
        ],
        out_specs=pl.BlockSpec((tb, S), lambda b: (b, 0)),   # lane-dense output
    )

    # Live VMEM: double-buffered x/out blocks + single-buffered weights.
    x_block_bytes = tb * S * D * x_itemsize
    out_block_bytes = tb * S * 4
    vmem_est = 2 * (x_block_bytes + out_block_bytes) + weight_bytes
    # Raise the scoped limit (v5e default 16 MiB) but stay well under v7x's
    # 64 MiB physical VMEM.
    vmem_limit = int(min(max(2 * vmem_est, 32 << 20), 48 << 20))

    cost = pl.CostEstimate(
        flops=2 * B * S * (D * H1 + H1 * H2 + H2),
        transcendentals=B * S,
        bytes_accessed=B * S * D * x_itemsize + weight_bytes + B * S * 4,
    )

    out = pl.pallas_call(
        _attention_kernel,
        out_shape=jax.ShapeDtypeStruct((B, S), jnp.float32),
        grid_spec=grid_spec,
        compiler_params=pltpu.CompilerParams(
            dimension_semantics=("parallel",),
            vmem_limit_bytes=vmem_limit),
        cost_estimate=cost,
    )(x, w1_bf, b1, w2_bf, b2, w3_row)

    return out[:, :, None]                                   # (B, S, 1)


def init_params(key, input_size):
    """Deterministic init mirroring nn.Linear default (U(-1/sqrt(fan_in), ...))."""
    h1 = input_size // 2
    h2 = input_size // 4
    ks = jax.random.split(key, 6)

    def lin(kw, kb, fan_in, fan_out):
        bound = 1.0 / jnp.sqrt(fan_in)
        w = jax.random.uniform(kw, (fan_in, fan_out), jnp.float32, -bound, bound)
        b = jax.random.uniform(kb, (1, fan_out), jnp.float32, -bound, bound)
        return w, b

    w1, b1 = lin(ks[0], ks[1], input_size, h1)
    w2, b2 = lin(ks[2], ks[3], h1, h2)
    w3, b3 = lin(ks[4], ks[5], h2, 1)
    return (w1, b1, w2, b2, w3, b3)


def reference_forward(x, params):
    w1, b1, w2, b2, w3, b3 = params
    h1 = jnp.maximum(x @ w1 + b1, 0.0)
    h2 = jnp.maximum(h1 @ w2 + b2, 0.0)
    logits = h2 @ w3 + b3                       # (B, S, 1)
    return jax.nn.softmax(logits, axis=1)


if __name__ == "__main__":
    B, S, D = 2, 8, 32  # batch, sequence length, input_size
    key = jax.random.PRNGKey(0)
    kx, kp = jax.random.split(key)

    x = jax.random.normal(kx, (B, S, D), dtype=jnp.float32)
    params = init_params(kp, D)

    out = attention_net_forward(x, params)
    out = jax.block_until_ready(out)

    ref = reference_forward(x, params)
    assert out.shape == (B, S, 1)
    # bf16 MXU operands -> relaxed tolerance vs the f32 reference.
    assert jnp.allclose(out, ref, atol=1e-2, rtol=1e-2), "mismatch vs reference"
    # exact divide in the softmax epilogue -> rows sum to 1 to ~f32 precision.
    assert jnp.allclose(jnp.sum(out, axis=1), 1.0, atol=1e-4)

    print("KERNEL_OK")
</pallas_src>

<mosaic_0001>
module attributes {stable_mosaic.version = 11 : i64} {
  func.func @_attention_kernel(%arg0: i32, %arg1: memref<2x8x32xf32, #tpu.memory_space<vmem>>, %arg2: memref<32x16xbf16, #tpu.memory_space<vmem>>, %arg3: memref<1x16xf32, #tpu.memory_space<vmem>>, %arg4: memref<16x8xbf16, #tpu.memory_space<vmem>>, %arg5: memref<1x8xf32, #tpu.memory_space<vmem>>, %arg6: memref<1x8xf32, #tpu.memory_space<vmem>>, %arg7: memref<2x8xf32, #tpu.memory_space<vmem>>) attributes {dimension_semantics = [#tpu.dimension_semantics<parallel>], iteration_bounds = array<i64: 1>, scalar_prefetch = 0 : i64, scratch_operands = 0 : i64, tpu.core_type = #tpu.core_type<tc>, window_params = [{transform_indices = @transform_0, window_bounds = array<i64: 2, 8, 32>}, {pipeline_mode = #tpu.pipeline_mode<synchronous>, transform_indices = @transform_1, window_bounds = array<i64: 32, 16>}, {pipeline_mode = #tpu.pipeline_mode<synchronous>, transform_indices = @transform_2, window_bounds = array<i64: 1, 16>}, {pipeline_mode = #tpu.pipeline_mode<synchronous>, transform_indices = @transform_3, window_bounds = array<i64: 16, 8>}, {pipeline_mode = #tpu.pipeline_mode<synchronous>, transform_indices = @transform_4, window_bounds = array<i64: 1, 8>}, {pipeline_mode = #tpu.pipeline_mode<synchronous>, transform_indices = @transform_5, window_bounds = array<i64: 1, 8>}, {transform_indices = @transform_6, window_bounds = array<i64: 2, 8>}]} {
    %c0 = arith.constant 0 : index
    %c0_0 = arith.constant 0 : index
    %c0_1 = arith.constant 0 : index
    %0 = vector.load %arg1[%c0, %c0_0, %c0_1] : memref<2x8x32xf32, #tpu.memory_space<vmem>>, vector<2x8x32xf32>
    %1 = vector.shape_cast %0 : vector<2x8x32xf32> to vector<16x32xf32>
    %2 = arith.truncf %1 : vector<16x32xf32> to vector<16x32xbf16>
    %c0_2 = arith.constant 0 : index
    %c0_3 = arith.constant 0 : index
    %3 = vector.load %arg2[%c0_2, %c0_3] : memref<32x16xbf16, #tpu.memory_space<vmem>>, vector<32x16xbf16>
    %cst = arith.constant dense<0.000000e+00> : vector<16x16xf32>
    %4 = tpu.matmul %2, %3, %cst {dimension_numbers = #tpu.dot_dimension_numbers<[1], [0], [0], [1], [0, 0, 1, 1], [], []>} : vector<16x32xbf16>, vector<32x16xbf16>, vector<16x16xf32> -> vector<16x16xf32>
    %c0_4 = arith.constant 0 : index
    %c0_5 = arith.constant 0 : index
    %5 = vector.load %arg3[%c0_4, %c0_5] : memref<1x16xf32, #tpu.memory_space<vmem>>, vector<1x16xf32>
    %6 = vector.broadcast %5 : vector<1x16xf32> to vector<16x16xf32>
    %7 = arith.addf %4, %6 : vector<16x16xf32>
    %cst_6 = arith.constant 0.000000e+00 : f32
    %8 = vector.broadcast %cst_6 : f32 to vector<16x16xf32>
    %9 = arith.maximumf %7, %8 : vector<16x16xf32>
    %10 = arith.truncf %9 : vector<16x16xf32> to vector<16x16xbf16>
    %c0_7 = arith.constant 0 : index
    %c0_8 = arith.constant 0 : index
    %11 = vector.load %arg4[%c0_7, %c0_8] : memref<16x8xbf16, #tpu.memory_space<vmem>>, vector<16x8xbf16>
    %cst_9 = arith.constant dense<0.000000e+00> : vector<16x8xf32>
    %12 = tpu.matmul %10, %11, %cst_9 {dimension_numbers = #tpu.dot_dimension_numbers<[1], [0], [0], [1], [0, 0, 1, 1], [], []>} : vector<16x16xbf16>, vector<16x8xbf16>, vector<16x8xf32> -> vector<16x8xf32>
    %c0_10 = arith.constant 0 : index
    %c0_11 = arith.constant 0 : index
    %13 = vector.load %arg5[%c0_10, %c0_11] : memref<1x8xf32, #tpu.memory_space<vmem>>, vector<1x8xf32>
    %14 = vector.broadcast %13 : vector<1x8xf32> to vector<16x8xf32>
    %15 = arith.addf %12, %14 : vector<16x8xf32>
    %cst_12 = arith.constant 0.000000e+00 : f32
    %16 = vector.broadcast %cst_12 : f32 to vector<16x8xf32>
    %17 = arith.maximumf %15, %16 : vector<16x8xf32>
    %18 = vector.shape_cast %17 : vector<16x8xf32> to vector<2x8x8xf32>
    %c0_13 = arith.constant 0 : index
    %c0_14 = arith.constant 0 : index
    %19 = vector.load %arg6[%c0_13, %c0_14] : memref<1x8xf32, #tpu.memory_space<vmem>>, vector<1x8xf32>
    %20 = vector.shape_cast %19 : vector<1x8xf32> to vector<1x1x8xf32>
    %21 = vector.broadcast %20 : vector<1x1x8xf32> to vector<2x8x8xf32>
    %22 = arith.mulf %18, %21 : vector<2x8x8xf32>
    %cst_15 = arith.constant dense<0.000000e+00> : vector<2x8xf32>
    %23 = vector.multi_reduction <add>, %22, %cst_15 [2] : vector<2x8x8xf32> to vector<2x8xf32>
    %cst_16 = arith.constant dense<0xFF800000> : vector<2xf32>
    %24 = vector.multi_reduction <maximumf>, %23, %cst_16 [1] : vector<2x8xf32> to vector<2xf32>
    %25 = vector.shape_cast %24 : vector<2xf32> to vector<2x1xf32>
    %26 = vector.broadcast %25 : vector<2x1xf32> to vector<2x8xf32>
    %27 = arith.subf %23, %26 : vector<2x8xf32>
    %28 = math.exp %27 : vector<2x8xf32>
    %cst_17 = arith.constant dense<0.000000e+00> : vector<2xf32>
    %29 = vector.multi_reduction <add>, %28, %cst_17 [1] : vector<2x8xf32> to vector<2xf32>
    %30 = vector.shape_cast %29 : vector<2xf32> to vector<2x1xf32>
    %31 = vector.broadcast %30 : vector<2x1xf32> to vector<2x8xf32>
    %32 = arith.divf %28, %31 : vector<2x8xf32>
    %c0_18 = arith.constant 0 : index
    %c0_19 = arith.constant 0 : index
    %33 = vector.load %arg7[%c0_18, %c0_19] : memref<2x8xf32, #tpu.memory_space<vmem>>, vector<2x8xf32>
    tpu.vector_store %arg7[%c0_18, %c0_19], %32 {strides = array<i32>} : memref<2x8xf32, #tpu.memory_space<vmem>>, vector<2x8xf32>,
    return
  }
  func.func @transform_0(%arg0: i32) -> (i32, i32, i32) {
    %c0_i32 = arith.constant 0 : i32
    %c0_i32_0 = arith.constant 0 : i32
    %c0_i32_1 = arith.constant 0 : i32
    return %arg0, %c0_i32, %c0_i32_0 : i32, i32, i32
  }
  func.func @transform_1(%arg0: i32) -> (i32, i32) {
    %c0_i32 = arith.constant 0 : i32
    %c0_i32_0 = arith.constant 0 : i32
    %c0_i32_1 = arith.constant 0 : i32
    return %c0_i32, %c0_i32_0 : i32, i32
  }
  func.func @transform_2(%arg0: i32) -> (i32, i32) {
    %c0_i32 = arith.constant 0 : i32
    %c0_i32_0 = arith.constant 0 : i32
    %c0_i32_1 = arith.constant 0 : i32
    return %c0_i32, %c0_i32_0 : i32, i32
  }
  func.func @transform_3(%arg0: i32) -> (i32, i32) {
    %c0_i32 = arith.constant 0 : i32
    %c0_i32_0 = arith.constant 0 : i32
    %c0_i32_1 = arith.constant 0 : i32
    return %c0_i32, %c0_i32_0 : i32, i32
  }
  func.func @transform_4(%arg0: i32) -> (i32, i32) {
    %c0_i32 = arith.constant 0 : i32
    %c0_i32_0 = arith.constant 0 : i32
    %c0_i32_1 = arith.constant 0 : i32
    return %c0_i32, %c0_i32_0 : i32, i32
  }
  func.func @transform_5(%arg0: i32) -> (i32, i32) {
    %c0_i32 = arith.constant 0 : i32
    %c0_i32_0 = arith.constant 0 : i32
    %c0_i32_1 = arith.constant 0 : i32
    return %c0_i32, %c0_i32_0 : i32, i32
  }
  func.func @transform_6(%arg0: i32) -> (i32, i32) {
    %c0_i32 = arith.constant 0 : i32
    %c0_i32_0 = arith.constant 0 : i32
    return %arg0, %c0_i32 : i32, i32
  }
}

</mosaic_0001>

<bundles_post_ra>
// kernel: tpu_custom_call.1
= control target key start
LH: loop header
LB: loop body
LE: loop exit
PB: predicated region body
PF: predicated region fallthrough
CT: control target
= control target key end

     0   :  { %v350_v1 = vmov 0.0   ;;  %vm351_vm0 = vmmov 0   ;;  %s431_s0 = inlined_call_operand.vmem [shape: f32[2,8,32], index: 0, kind: input, shape index: {}]   ;;  %s432_s1 = inlined_call_operand.vmem [shape: bf16[32,16], index: 1, kind: input, shape index: {}]   ;;  %s433_s2 = inlined_call_operand.vmem [shape: f32[1,16], index: 2, kind: input, shape index: {}]   ;;  %s434_s3 = inlined_call_operand.vmem [shape: bf16[16,8], index: 3, kind: input, shape index: {}]   ;;  %s435_s4 = inlined_call_operand.vmem [shape: f32[1,8], index: 4, kind: input, shape index: {}]   ;;  %s436_s5 = inlined_call_operand.vmem [shape: f32[1,8], index: 5, kind: input, shape index: {}]   ;;  %s437_s6 = inlined_call_operand.hbm [shape: f32[2,8], index: 6, kind: output, shape index: {}]  }
   0x1   :  { %v315_v0 = vld [vmem:[%s432_s1] sm:$0xff]   ;;  %295 = vmatprep.subr.bf16.mxu0 %v350_v1  ;;  %303 = vmatprep.subr.bf16.mxu1 %v350_v1  ;;  %v316_v2 = vld [vmem:[%s432_s1 + $0x8] sm:$0xff]  }
   0x2   :  { %296 = vmatpush3.bf16.msra.mxu0 %v315_v0  ;;  %299 = vmatprep.mubr.msk.bf16.mxu0 %vm351_vm0, %v350_v1  ;;  %v25_v3 = vld [vmem:[%s431_s0] sm:$0xff]  ;;  %v26_v4 = vld [vmem:[%s431_s0 + $0x8] sm:$0xff] }
   0x3   :  { %297 = vmatprep.subr.bf16.mxu0 %v350_v1  ;;  %305 = vmatprep.mubr.msk.bf16.mxu1 %vm351_vm0, %v350_v1 }
   0x4   :  { %11 = vsyncpa [#allocation3], 0  ;;  %v27_v5 = vpack.c.bf16 %v26_v4, %v25_v3  ;;  %vm51_vm1 = vcmask 261120   ;;  %v317_v6 = vld [vmem:[%s434_s3] sm:$0xff]   ;;  %vm114_vm2 = vcmask 130048   ;;  %vm170_vm3 = vcmask 64512  }
   0x5   :  { %304 = vmatpush3.bf16.msra.mxu1 %v317_v6  ;;  %v282_v7 = vld [vmem:[%s433_s2] ss:$0 sm:$0xff]  ;;  %v179_v31 = vlaneseq  ;;  %vm189_vm4 = vcmask 1041409   ;;  %vm192_vm5 = vcmask 58368   ;;  %v352_v41 = vmov 0  }
   0x6   :  { %298 = vmatpush3.bf16.msra.mxu0 %v316_v2  ;;  %v286_v17 = vld [vmem:[%s435_s4] ss:$0 sm:$0xff]  ;;  %314 = vset.pattern.permute.xlu0 %v352_v41  ;;  %s353_s4 = smov [#allocation2]  }
   0x7   :  { %v289_v22 = vld [vmem:[%s436_s5] ss:$0 sm:$0xff]  ;;  %v180_v32 = vand.u32 127, %v179_v31  ;;  %v182_v33 = vshrl.u32 %v179_v31, 7  ;;  %313 = vset.pattern.permute.xlu1 %v352_v41  ;;  %s274_s5 = sshll.u32 %s353_s4, 4  ;;  %s275_s5 = int_to_ptr.vmem [resolvable:$true] %s274_s5 }
   0x8   :  { %s326_s9 = scalar_lea.vmem %s275_s5, 32  ;;  %p331_p1 = scmp.lt.s32.totalorder %s275_s5, %s275_s5 }
   0x9   :  { %300 = vmatmul.mubr.msk.bf16.vlgmr.msra.gmra.mrb[0].mxu0 %vm51_vm1, %v27_v5  ;;  %v183_v35 = vsub.s32 %v180_v32, %v182_v33  ;;  %v199_v42 = vsub.s32 0, %v182_v33  ;;  %v203_v43 = vsub.s32 1, %v182_v33  ;;  %p327_p0 = scmp.ne.s32.totalorder %s275_s5, %s326_s9  ;;  %p332_p2 = scmp.lt.s32.totalorder %s326_s9, %s326_s9 }
   0xb   :  { %p333_p3 = por %p332_p2, %p331_p1 }
   0xd   :  { %p334_p4 = pnand %p333_p3, %p327_p0 }
  0xdc   :  { %v89_v8 = vpop.f32.mrb[0].mxu0 }
  0xdd   :  { %v90_v9 = vadd.f32 %v282_v7, %v89_v8  ;;  %v301_v10 = vpop.f32.mrb[1].mxu0 }
  0xde   :  { %v92_v11 = vpop.f32.mrb[2].mxu0 }
  0xdf   :  { %v93_v12 = vadd.f32 %v282_v7, %v92_v11  ;;  %v302_v13 = vpop.f32.mrb[3].mxu0  ;;  %v96_v14 = vmax.f32 %v90_v9, 0.0 }
  0xe1   :  { %v97_v15 = vmax.f32 %v93_v12, 0.0 }
  0xe3   :  { %v98_v16 = vpack.c.bf16 %v97_v15, %v96_v14 }
  0xe5   :  { %306 = vmatmul.mubr.msk.bf16.vlgmr.msra.gmra.mrb[0].mxu1 %vm114_vm2, %v98_v16 }
 0x1b8   :  { %v152_v18 = vpop.f32.mrb[0].mxu1 }
 0x1b9   :  { %v153_v19 = vadd.f32 %v286_v17, %v152_v18  ;;  %v307_v20 = vpop.f32.mrb[1].mxu1 }
 0x1ba   :  { %v155_v21 = vpop.f32.mrb[2].mxu1 }
 0x1bb   :  { %v159_v23 = vmax.f32 %v153_v19, 0.0  ;;  %v156_v24 = vadd.f32 %v286_v17, %v155_v21  ;;  %v308_v25 = vpop.f32.mrb[3].mxu1 }
 0x1bd   :  { %v160_v26 = vmax.f32 %v156_v24, 0.0  ;;  %v168_v27 = vmul.f32 %v289_v22, %v159_v23 }
 0x1bf   :  { %v171_v28 = vsel %vm170_vm3, %v168_v27, 0.0  ;;  %v169_v29 = vmul.f32 %v289_v22, %v160_v26 }
 0x1c0   :  { %172 = vadd.xlane.f32.xlu0 %v171_v28 }
 0x1c1   :  { %v174_v30 = vsel %vm170_vm3, %v169_v29, 0.0 }
 0x1c4   :  { %175 = vadd.xlane.f32.xlu0 %v174_v30 }
 0x24d   :  { %v173_v34 = vpop.xlane.xlu0 %172 }
 0x24e   :  { %v184_v37 = vrot.slane %v173_v34, %v183_v35 }
 0x251   :  { %v176_v36 = vpop.xlane.xlu0 %175 }
 0x252   :  { %v188_v38 = vrot.slane %v176_v36, %v183_v35 }
 0x254   :  { %v190_v39 = vsel %vm189_vm4, %v188_v38, %v184_v37 }
 0x255   :  { %v193_v40 = vsel %vm192_vm5, %v190_v39, -inf }
 0x256   :  { %194 = vmax.xlane.f32.xlu1 %v193_v40 }
 0x2e3   :  { %v195_v44 = vpop.xlane.xlu1 %194 }
 0x2e4   :  { %v200_v45 = vrot.slane %v195_v44, %v199_v42  ;;  %v204_v46 = vrot.slane %v195_v44, %v203_v43 }
 0x2e6   :  { %v207_v47 = vsub.f32 %v173_v34, %v200_v45  ;;  %v208_v48 = vsub.f32 %v176_v36, %v204_v46 }
 0x2e8   :  { %v209_v49 = vmul.f32 1.442695, %v207_v47  ;;  %v211_v50 = vmul.f32 1.442695, %v208_v48 }
 0x2ea   :  { %318 = vpow2.f32 %v209_v49 }
 0x2eb   :  { %320 = vpow2.f32 %v211_v50 }
 0x2f4   :  { %v319_v51 = vpop.eup %318 }
 0x2f5   :  { %v321_v52 = vpop.eup %320  ;;  %216 = vperm.xlu1 %313, %v319_v51  }
 0x2f6   :  { %219 = vperm.xlu0 %314, %v321_v52  }
 0x374   :  { %v217_v53 = vpop.permute.xlu1 %216 }
 0x375   :  { %v220_v54 = vpop.permute.xlu0 %219  ;;  %v224_v55 = vrot.slane %v217_v53, %v183_v35 }
 0x376   :  { %v228_v56 = vrot.slane %v220_v54, %v183_v35 }
 0x378   :  { %v229_v57 = vsel %vm189_vm4, %v228_v56, %v224_v55 }
 0x379   :  { %v231_v58 = vsel %vm192_vm5, %v229_v57, 0.0 }
 0x37a   :  { %232 = vadd.xlane.f32.xlu1 %v231_v58 }
 0x407   :  { %v233_v59 = vpop.xlane.xlu1 %232 }
 0x408   :  { %v238_v60 = vrot.slane %v233_v59, %v199_v42  ;;  %v242_v61 = vrot.slane %v233_v59, %v203_v43 }
 0x40a   :  { %322 = vrcp.f32 %v238_v60 }
 0x40b   :  { %324 = vrcp.f32 %v242_v61 }
 0x414   :  { %v323_v62 = vpop.eup %322 }
 0x415   :  { %v246_v63 = vmul.f32 %v323_v62, %v319_v51  ;;  %v325_v0 = vpop.eup %324 }
 0x416   :  { %v248_v1 = vmul.f32 %v325_v0, %v321_v52 }
 0x417   :  { %252 = vperm.xlu0 %314, %v246_v63  }
 0x41b   :  { %255 = vperm.xlu0 %314, %v248_v1  }
 0x496   :  { %v253_v2 = vpop.permute.xlu0 %252 }
 0x497   :  { %v260_v4 = vrot.slane %v253_v2, %v183_v35 }
 0x49a   :  { %v256_v3 = vpop.permute.xlu0 %255 }
 0x49b   :  { %v264_v5 = vrot.slane %v256_v3, %v183_v35 }
 0x49d   :  { %v265_v6 = vsel %vm189_vm4, %v264_v5, %v260_v4 }
 0x49e   :  { %267 = vst.msk [vmem:[#allocation2] sm:$0x3] %vm192_vm5, %v265_v6 }
 0x49f   :  { %337 = shalt.err (!%p334_p4)
}
 0x4a0   :  { %s338_s12 = scalar_lea.hbm %s437_s6, 32 }
 0x4a1   :  { %p339_p5 = scmp.ne.s32.totalorder %s437_s6, %s338_s12  ;;  %p342_p6 = scmp.lt.u32.totalorder %s338_s12, %s437_s6 }
 0x4a3   :  { %p344_p7 = pnand %p342_p6, %p339_p5 }
 0x4a5   :  { %347 = shalt.err (!%p344_p7)
}
 0x4a6   :  { %277 = dma.vmem_to_hbm [thread:$0]  %s275_s5, 32, %s437_s6, [#allocation3]  }
 0x4a7   :  { %348 = dma.done.wait [#allocation3], 32  }
 0x4a8   :  { %349 = vsyncadd [#allocation3], 4294967264 }
 0x4a9   :  { %281 = vsyncpa [#allocation3], 1 }

</bundles_post_ra>
